<compile_context>
chip_gen: v7x
topology: tpu7x:2x2x1
jax: 0.10.0
libtpu: 0.0.40
codegen_flags: <defaults>
</compile_context>

<pallas_src>
import jax
import jax.numpy as jnp
import numpy as np
from jax.experimental import pallas as pl
from jax.experimental.pallas import tpu as pltpu


def _se_gate_kernel(x_ref, w1_ref, w2_ref, g_ref):
    # x_ref : (1, M, C) one batch element, NHWC flattened over space (f32)
    # w1_ref: (CH, C)   fc1 weight (out_features x in_features)
    # w2_ref: (CH, C)   fc2 weight transposed to (hidden, C)
    # g_ref : (1, 1, C) per-batch sigmoid gate
    M = x_ref.shape[1]
    xb = x_ref[0].astype(jnp.float32)                                        # (M, C)
    avg = jnp.sum(xb, axis=0, keepdims=True) * (1.0 / M)                     # (1, C)
    # Tiny fc1/fc2 stay on the VPU/XLU/EUP (M=1 dots would underfill the MXU).
    h = jnp.maximum(jnp.sum(avg * w1_ref[...], axis=1, keepdims=True), 0.0)  # (CH, 1)
    s = jax.nn.sigmoid(jnp.sum(h * w2_ref[...], axis=0, keepdims=True))      # (1, C)
    g_ref[0] = s.astype(g_ref.dtype)


def _make_conv_kernel(Ht, W, C):
    """Gated 3x3 pad-1 conv + bias + ReLU for one (batch, row-tile) grid step."""
    Mt = Ht * W

    def kernel(xp_ref, g_ref, cw_ref, cb_ref, o_ref, slab_ref):
        # xp_ref  : (1, H+2, W+2, C) zero-padded NHWC image of this batch element
        # g_ref   : (1, 9C, 1)       per-(tap, cin) gate column for this batch element
        # cw_ref  : (9C, Np)         conv weight in im2col layout, N zero-padded to 128
        # cb_ref  : (1, Np)          conv bias, zero-padded
        # o_ref   : (1, Mt, Np)      lane-dense output tile
        # slab_ref: (Mt, 9C)         VMEM scratch holding the im2col patches
        r0 = pl.program_id(1) * Ht

        # ---- in-kernel im2col: 9 shifted (Ht, W, C) windows of the padded image ----
        # (loads are upcast to f32 so slicing/reshaping is layout-simple; the store
        #  casts to the matmul dtype, so a bf16 slab still halves scratch VMEM)
        for ky in range(3):
            rows = xp_ref[0, pl.ds(r0 + ky, Ht)].astype(jnp.float32)   # (Ht, W+2, C)
            for kx in range(3):
                t = 3 * ky + kx
                tap = rows[:, kx:kx + W, :].reshape(Mt, C)
                slab_ref[:, t * C:(t + 1) * C] = tap.astype(slab_ref.dtype)

        # ---- fold the SE gate into the weights (per input channel), not the slab ----
        cw_g = (cw_ref[...] * g_ref[0]).astype(slab_ref.dtype)          # (9C, Np)

        # ---- one lane-dense MXU matmul per tile, f32 accumulation ----
        acc = jnp.dot(slab_ref[...], cw_g, preferred_element_type=jnp.float32)  # (Mt, Np)
        o_ref[0] = jnp.maximum(acc + cb_ref[...], 0.0).astype(o_ref.dtype)

    return kernel


def _pick_row_tile(H, W, target_rows=512):
    """Largest Ht dividing H with Ht*W <= target_rows and Ht*W a multiple of 8
    (sublane-aligned output tiles).  Falls back to the full height (one tile)."""
    upper = min(H, max(1, target_rows // W))
    for ht in range(upper, 0, -1):
        if H % ht == 0 and (ht * W) % 8 == 0:
            return ht
    return H


def channel_attention(x_nchw, fc1_w, fc2_w, conv_w, conv_b,
                      *, matmul_dtype=jnp.float32, row_tile_target=512):
    """x_nchw: (B, C, H, W); fc1_w: (CH, C); fc2_w: (C, CH);
    conv_w: (Cout, C, 3, 3); conv_b: (Cout,).  Returns (B, Cout, H, W)."""
    B, C, H, W = x_nchw.shape
    Cout = conv_w.shape[0]
    CH = fc1_w.shape[0]
    assert conv_w.shape[1:] == (C, 3, 3), "kernel is specialized to 3x3, padding=1"
    M = H * W
    K9 = 9 * C
    Np = pl.cdiv(Cout, 128) * 128              # lane-dense padded output channels

    # NCHW -> NHWC (layout plumbing; the module math itself runs in the kernels).
    x_nhwc = jnp.transpose(x_nchw, (0, 2, 3, 1))

    # ---------------- pass 1: per-batch squeeze-excite gate (tiny) ----------------
    gate = pl.pallas_call(
        _se_gate_kernel,
        out_shape=jax.ShapeDtypeStruct((B, 1, C), jnp.float32),
        grid_spec=pltpu.PrefetchScalarGridSpec(
            num_scalar_prefetch=0,
            grid=(B,),
            in_specs=[
                pl.BlockSpec((1, M, C), lambda b: (b, 0, 0)),
                pl.BlockSpec((CH, C), lambda b: (0, 0)),
                pl.BlockSpec((CH, C), lambda b: (0, 0)),
            ],
            out_specs=pl.BlockSpec((1, 1, C), lambda b: (b, 0, 0)),
        ),
        compiler_params=pltpu.CompilerParams(dimension_semantics=("parallel",)),
    )(x_nhwc.reshape(B, M, C), fc1_w, jnp.transpose(fc2_w))

    # Per-(tap, cin) gate column in the slab's tap-major order: g9[b, t*C + c] = gate[b, c]
    g9 = jnp.tile(gate, (1, 9, 1)).reshape(B, K9, 1)

    # ---------------- pass 2: gated 3x3 conv + bias + ReLU ----------------
    # Zero-padded NHWC image (padding=1 SAME conv); bf16 here halves input DMA bytes
    # when matmul_dtype is bf16 (the gate path stays f32).
    xpad = jnp.pad(x_nhwc, ((0, 0), (1, 1), (1, 1), (0, 0))).astype(matmul_dtype)

    # 3x3 conv weights in im2col layout (row = tap*C + cin), N zero-padded to 128 lanes.
    cw = jnp.transpose(conv_w, (2, 3, 1, 0)).reshape(K9, Cout).astype(jnp.float32)
    cw = jnp.pad(cw, ((0, 0), (0, Np - Cout)))
    cb = jnp.pad(conv_b.astype(jnp.float32), (0, Np - Cout)).reshape(1, Np)

    Ht = _pick_row_tile(H, W, row_tile_target)
    Mt = Ht * W
    MT = H // Ht
    # TODO(synk): for very large feature maps the whole padded image per batch may not fit
    # v7x's 64 MiB VMEM; tile the padded-input rows with a 2-row halo (manual DMA) instead.

    cost = pl.CostEstimate(
        flops=2 * B * M * K9 * Np,             # Np=128 is what the padded MXU matmul executes
        transcendentals=0,
        bytes_accessed=int(xpad.size) * xpad.dtype.itemsize
        + int(cw.size + cb.size + g9.size) * 4
        + B * M * Np * x_nchw.dtype.itemsize,
    )

    out = pl.pallas_call(
        _make_conv_kernel(Ht, W, C),
        out_shape=jax.ShapeDtypeStruct((B, M, Np), x_nchw.dtype),
        grid_spec=pltpu.PrefetchScalarGridSpec(
            num_scalar_prefetch=0,
            grid=(B, MT),                       # batch x row-tiles, both independent
            in_specs=[
                # Padded image: index is constant across the inner row-tile axis, so it
                # is fetched once per batch element and sliced in-kernel (no 9x slab).
                pl.BlockSpec((1, H + 2, W + 2, C), lambda b, mt: (b, 0, 0, 0)),
                pl.BlockSpec((1, K9, 1), lambda b, mt: (b, 0, 0)),
                # Constant-index weights/bias: fetched once; single-buffering them
                # (pipeline_mode=pl.Buffered(1)) would save ~150 KB VMEM if ever needed.
                pl.BlockSpec((K9, Np), lambda b, mt: (0, 0)),
                pl.BlockSpec((1, Np), lambda b, mt: (0, 0)),
            ],
            out_specs=pl.BlockSpec((1, Mt, Np), lambda b, mt: (b, mt, 0)),
            scratch_shapes=[pltpu.VMEM((Mt, K9), matmul_dtype)],
        ),
        compiler_params=pltpu.CompilerParams(
            dimension_semantics=("parallel", "parallel"),   # v7x: 2 TCs split (b, mt)
            vmem_limit_bytes=32 * 1024 * 1024),
        cost_estimate=cost,
    )(xpad, g9, cw, cb)

    # Drop the lane padding and return NCHW (module semantics).  A fused consumer could
    # keep the (B, M, Np) lane-dense layout and skip this extra pass.
    out = out[:, :, :Cout].reshape(B, H, W, Cout)
    return jnp.transpose(out, (0, 3, 1, 2))


def reference(x, fc1_w, fc2_w, conv_w, conv_b):
    """Pure-JAX reference matching the PyTorch forward."""
    avg = jnp.mean(x, axis=(2, 3))                         # (B, C)
    h = jnp.maximum(avg @ fc1_w.T, 0.0)
    s = jax.nn.sigmoid(h @ fc2_w.T)                        # (B, C)
    scaled = x * s[:, :, None, None]
    out = jax.lax.conv_general_dilated(
        scaled, conv_w, window_strides=(1, 1), padding="SAME",
        dimension_numbers=("NCHW", "OIHW", "NCHW"),
        precision=jax.lax.Precision.HIGHEST)
    out = out + conv_b[None, :, None, None]
    return jnp.maximum(out, 0.0)


if __name__ == "__main__":
    # in_planes=32, out_planes=16, ratio=16 -> hidden = 32 // 16 = 2
    B, C, H, W = 2, 32, 8, 8
    Cout, ratio = 16, 16
    CH = C // ratio

    key = jax.random.PRNGKey(0)
    k1, k2, k3, k4, k5 = jax.random.split(key, 5)

    x = jax.random.normal(k1, (B, C, H, W), jnp.float32)
    # nn.Linear weights: (out_features, in_features), bias=False
    fc1_w = jax.random.normal(k2, (CH, C), jnp.float32) * (1.0 / np.sqrt(C))
    fc2_w = jax.random.normal(k3, (C, CH), jnp.float32) * (1.0 / np.sqrt(CH))
    # conv3: kaiming_normal_(mode='fan_out', nonlinearity='relu'): std = sqrt(2/(Cout*9))
    conv_w = jax.random.normal(k4, (Cout, C, 3, 3), jnp.float32) * np.sqrt(2.0 / (Cout * 9))
    conv_b = jax.random.uniform(k5, (Cout,), jnp.float32, -0.1, 0.1)

    ref = jax.block_until_ready(reference(x, fc1_w, fc2_w, conv_w, conv_b))

    # f32 MXU operands: strict check against a Precision.HIGHEST reference.
    out = jax.block_until_ready(channel_attention(x, fc1_w, fc2_w, conv_w, conv_b))
    np.testing.assert_allclose(np.asarray(out), np.asarray(ref), rtol=1e-3, atol=1e-3)

    # bf16 MXU operands (f32 accumulation): recommended production setting on
    # v5e/v6e/v7x; validated at bf16-appropriate tolerance.
    out_bf16 = jax.block_until_ready(
        channel_attention(x, fc1_w, fc2_w, conv_w, conv_b, matmul_dtype=jnp.bfloat16))
    np.testing.assert_allclose(np.asarray(out_bf16), np.asarray(ref), rtol=5e-2, atol=5e-2)

    print("KERNEL_OK")
</pallas_src>

<mosaic_0001>
module attributes {stable_mosaic.version = 11 : i64} {
  func.func @_se_gate_kernel(%arg0: i32, %arg1: memref<1x64x32xf32, #tpu.memory_space<vmem>>, %arg2: memref<2x32xf32, #tpu.memory_space<vmem>>, %arg3: memref<2x32xf32, #tpu.memory_space<vmem>>, %arg4: memref<1x1x32xf32, #tpu.memory_space<vmem>>) attributes {dimension_semantics = [#tpu.dimension_semantics<parallel>], iteration_bounds = array<i64: 2>, scalar_prefetch = 0 : i64, scratch_operands = 0 : i64, tpu.core_type = #tpu.core_type<tc>, window_params = [{transform_indices = @transform_0, window_bounds = array<i64: 1, 64, 32>}, {pipeline_mode = #tpu.pipeline_mode<synchronous>, transform_indices = @transform_1, window_bounds = array<i64: 2, 32>}, {pipeline_mode = #tpu.pipeline_mode<synchronous>, transform_indices = @transform_2, window_bounds = array<i64: 2, 32>}, {transform_indices = @transform_3, window_bounds = array<i64: 1, 1, 32>}]} {
    %c0 = arith.constant 0 : index
    %c0_0 = arith.constant 0 : index
    %c0_1 = arith.constant 0 : index
    %0 = vector.load %arg1[%c0, %c0_0, %c0_1] : memref<1x64x32xf32, #tpu.memory_space<vmem>>, vector<1x64x32xf32>
    %1 = vector.shape_cast %0 : vector<1x64x32xf32> to vector<64x32xf32>
    %cst = arith.constant dense<0.000000e+00> : vector<32xf32>
    %2 = vector.multi_reduction <add>, %1, %cst [0] : vector<64x32xf32> to vector<32xf32>
    %3 = vector.shape_cast %2 : vector<32xf32> to vector<1x32xf32>
    %cst_2 = arith.constant 1.562500e-02 : f32
    %4 = vector.broadcast %cst_2 : f32 to vector<1x32xf32>
    %5 = arith.mulf %3, %4 : vector<1x32xf32>
    %c0_3 = arith.constant 0 : index
    %c0_4 = arith.constant 0 : index
    %6 = vector.load %arg2[%c0_3, %c0_4] : memref<2x32xf32, #tpu.memory_space<vmem>>, vector<2x32xf32>
    %7 = vector.broadcast %5 : vector<1x32xf32> to vector<2x32xf32>
    %8 = arith.mulf %7, %6 : vector<2x32xf32>
    %cst_5 = arith.constant dense<0.000000e+00> : vector<2xf32>
    %9 = vector.multi_reduction <add>, %8, %cst_5 [1] : vector<2x32xf32> to vector<2xf32>
    %10 = vector.shape_cast %9 : vector<2xf32> to vector<2x1xf32>
    %cst_6 = arith.constant 0.000000e+00 : f32
    %11 = vector.broadcast %cst_6 : f32 to vector<2x1xf32>
    %12 = arith.maximumf %10, %11 : vector<2x1xf32>
    %c0_7 = arith.constant 0 : index
    %c0_8 = arith.constant 0 : index
    %13 = vector.load %arg3[%c0_7, %c0_8] : memref<2x32xf32, #tpu.memory_space<vmem>>, vector<2x32xf32>
    %14 = vector.broadcast %12 : vector<2x1xf32> to vector<2x32xf32>
    %15 = arith.mulf %14, %13 : vector<2x32xf32>
    %cst_9 = arith.constant dense<0.000000e+00> : vector<32xf32>
    %16 = vector.multi_reduction <add>, %15, %cst_9 [0] : vector<2x32xf32> to vector<32xf32>
    %17 = vector.shape_cast %16 : vector<32xf32> to vector<1x32xf32>
    %18 = arith.negf %17 : vector<1x32xf32>
    %19 = math.exp %18 : vector<1x32xf32>
    %cst_10 = arith.constant 1.000000e+00 : f32
    %20 = vector.broadcast %cst_10 : f32 to vector<1x32xf32>
    %21 = arith.addf %20, %19 : vector<1x32xf32>
    %22 = arith.divf %20, %21 : vector<1x32xf32>
    %c0_11 = arith.constant 0 : index
    %c0_12 = arith.constant 0 : index
    %c0_13 = arith.constant 0 : index
    %23 = vector.load %arg4[%c0_11, %c0_12, %c0_13] : memref<1x1x32xf32, #tpu.memory_space<vmem>>, vector<1x1x32xf32>
    %24 = vector.shape_cast %23 : vector<1x1x32xf32> to vector<1x32xf32>
    %25 = vector.shape_cast %22 : vector<1x32xf32> to vector<1x1x32xf32>
    tpu.vector_store %arg4[%c0_11, %c0_12, %c0_13], %25 {strides = array<i32>} : memref<1x1x32xf32, #tpu.memory_space<vmem>>, vector<1x1x32xf32>,
    return
  }
  func.func @transform_0(%arg0: i32) -> (i32, i32, i32) {
    %c0_i32 = arith.constant 0 : i32
    %c0_i32_0 = arith.constant 0 : i32
    %c0_i32_1 = arith.constant 0 : i32
    return %arg0, %c0_i32, %c0_i32_0 : i32, i32, i32
  }
  func.func @transform_1(%arg0: i32) -> (i32, i32) {
    %c0_i32 = arith.constant 0 : i32
    %c0_i32_0 = arith.constant 0 : i32
    %c0_i32_1 = arith.constant 0 : i32
    return %c0_i32, %c0_i32_0 : i32, i32
  }
  func.func @transform_2(%arg0: i32) -> (i32, i32) {
    %c0_i32 = arith.constant 0 : i32
    %c0_i32_0 = arith.constant 0 : i32
    %c0_i32_1 = arith.constant 0 : i32
    return %c0_i32, %c0_i32_0 : i32, i32
  }
  func.func @transform_3(%arg0: i32) -> (i32, i32, i32) {
    %c0_i32 = arith.constant 0 : i32
    %c0_i32_0 = arith.constant 0 : i32
    %c0_i32_1 = arith.constant 0 : i32
    return %arg0, %c0_i32, %c0_i32_0 : i32, i32, i32
  }
}

</mosaic_0001>

<bundles_post_ra>
// kernel: tpu_custom_call.1
= control target key start
LH: loop header
LB: loop body
LE: loop exit
PB: predicated region body
PF: predicated region fallthrough
CT: control target
= control target key end

     0   :  { %8 = vsyncpa [#allocation3], 0  ;;  %s544_s0 = inlined_call_operand.vmem [shape: f32[2,64,32], index: 0, kind: input, shape index: {}]   ;;  %s545_s1 = inlined_call_operand.vmem [shape: f32[2,32], index: 1, kind: input, shape index: {}]   ;;  %s546_s2 = inlined_call_operand.vmem [shape: f32[2,32], index: 2, kind: input, shape index: {}]   ;;  %s547_s3 = inlined_call_operand.hbm [shape: f32[2,1,32], index: 3, kind: output, shape index: {}]  }
   0x1   :  { %10 = vsyncpa [#allocation3 + $0x1], 0  ;;  %s430_s12 = smov 0   ;;  %s432_s13 = smov 0  }
   0x2   :  { %s434_s14 = smov 0   ;;  %s436_s15 = smov 0  }
   0x3 LB: > { %s451_s16 = sadd.s32 4294967295, %s407_s15   ;;  %s291_s17 = sadd.s32 4294967294, %s407_s15   ;;  %s407_s15 = sphi %s436_s15, %s553_s15   ;;  %s403_s14 = sphi %s434_s14, %s552_s14   ;;  %s399_s13 = sphi %s432_s13, %s551_s13   ;;  %s395_s12 = sphi %s430_s12, %s550_s12  }
   0x4   : > { %s455_s18 = sadd.s32 1, %s407_s15   ;;  %s91_s19 = sadd.s32 1, %s403_s14 }
   0x5   : > { %s88_s20 = ssub.s32 %s407_s15, %s455_s18  ;;  %p101_p0 = scmp.ne.s32.totalorder %s403_s14, %s399_s13 }
   0x6   : > { %p89_p1 = scmp.eq.s32.totalorder %s88_s20, 0  ;;  %p102_p2 = scmp.eq.s32.totalorder %s451_s16, 1 }
   0x7   : > { %p107_p3 = scmp.ne.s32.totalorder %s399_s13, %s395_s12  ;;  %p108_p4 = scmp.eq.s32.totalorder %s291_s17, 1 }
   0x8   : > { %s466_s21 = scalar_select %p89_p1, %s403_s14, %s91_s19  }
   0x9   : > { %p468_p5 = por %p102_p2, %p101_p0  ;;  %p472_p6 = por %p108_p4, %p107_p3 }
   0xa   : > { %p294_p7 = scmp.ge.s32.totalorder %s407_s15, 1  ;;  %p140_p8 = scmp.lt.s32.totalorder %s407_s15, 3 }
   0xc   : > { %p141_p9 = pnand %p294_p7, %p140_p8 }
   0xd   : > { %p163_p10 = scmp.lt.s32.totalorder (!%p141_p9), %s451_s16, 1  ;;  %vm176_vm0 = vcmask (!%p141_p9), 261120   ;;  %v199_v29 = vld [vmem:[%s545_s1] sm:$0x3] (!%p141_p9)  ;;  %vm201_vm1 = vcmask (!%p141_p9), 254976   ;;  %s161_s6 = sand.u32 (!%p141_p9), 1, %s399_s13  }
   0xe   : > { %144 = sbr.rel (%p141_p9) target bundleno = 257 (0x101), region = 32  ;;  %v206_v34 = vld [vmem:[%s546_s2] sm:$0x3] (!%p141_p9)  ;;  %s298_s7 = sshll.u32 (!%p141_p9), %s451_s16, 4  ;;  %vm221_vm2 = vcmask (!%p141_p9), 253952  }
   0xf   : > { %s162_s8 = scalar_lea.vmem (!%p141_p9), [#allocation2], %s161_s6  ;;  %s502_s17 = scalar_lea.hbm (!%p141_p9), %s547_s3, %s298_s7 }
  0x10   : > { %s236_s9 = sshll.u32 (!%p141_p9), %s162_s8, 4  ;;  %s224_s19 = scalar_lea.sflag (!%p141_p9), [#allocation3], %s161_s6  ;;  %s504_s9 = int_to_ptr.vmem [resolvable:$true] %s236_s9 }
  0x11   : > { %s345_s20 = scalar_lea.vmem (!%p141_p9), %s504_s9, 16 }
  0x12   : > { %p346_p11 = scmp.ne.s32.totalorder (!%p141_p9), %s504_s9, %s345_s20 }
  0x14   : > { %p347_p12 = pnand (!%p141_p9), %p346_p11, %p468_p5 }
  0x15   : > { %s164_s24 = scalar_select %p163_p10, %s451_s16, 1 }
  0x16   : > { %p348_p13 = pneg %p347_p12  ;;  %s409_s16 = smov [#allocation2]  }
  0x17   : > { %s301_s25 = sshll.u32 %s164_s24, 6  ;;  %s349_s24 = sshll.u32 %s409_s16, 4  ;;  %s350_s24 = int_to_ptr.vmem [resolvable:$false] %s349_s24 }
  0x18   : > { %s167_s28 = scalar_lea.vmem %s544_s0, %s301_s25  ;;  %s351_s25 = scalar_lea.vmem %s350_s24, 32 }
  0x19   : > { %v168_v0 = vld [vmem:[%s167_s28] sm:$0xff]  ;;  %v169_v1 = vld [vmem:[%s167_s28 + $0x8] sm:$0xff]  ;;  %v170_v2 = vld [vmem:[%s167_s28 + $0x10] sm:$0xff]  ;;  %p352_p0 = scmp.lt.s32.totalorder %s504_s9, %s350_s24  ;;  %p353_p1 = scmp.lt.s32.totalorder %s351_s25, %s345_s20 }
  0x1a   : > { %v171_v3 = vld [vmem:[%s167_s28 + $0x18] sm:$0xff]  ;;  %v177_v4 = vsel %vm176_vm0, %v168_v0, 0.0  ;;  %v178_v5 = vsel %vm176_vm0, %v169_v1, 0.0  ;;  %v180_v6 = vsel %vm176_vm0, %v170_v2, 0.0  ;;  %v172_v7 = vld [vmem:[%s167_s28 + $0x20] sm:$0xff]  ;;  %v173_v10 = vld [vmem:[%s167_s28 + $0x28] sm:$0xff] }
  0x1b   : > { %v179_v8 = vadd.f32 %v178_v5, %v177_v4  ;;  %v182_v9 = vsel %vm176_vm0, %v171_v3, 0.0  ;;  %v184_v12 = vsel %vm176_vm0, %v172_v7, 0.0  ;;  %v174_v13 = vld [vmem:[%s167_s28 + $0x30] sm:$0xff]  ;;  %v186_v15 = vsel %vm176_vm0, %v173_v10, 0.0  ;;  %v175_v16 = vld [vmem:[%s167_s28 + $0x38] sm:$0xff]  ;;  %p354_p2 = por %p353_p1, %p352_p0 }
  0x1c   : > { %v188_v18 = vsel %vm176_vm0, %v174_v13, 0.0  ;;  %v190_v20 = vsel %vm176_vm0, %v175_v16, 0.0 }
  0x1d   : > { %v181_v11 = vadd.f32 %v180_v6, %v179_v8  ;;  %p355_p3 = pnand %p354_p2, %p348_p13 }
  0x1f   : > { %v183_v14 = vadd.f32 %v182_v9, %v181_v11 }
  0x21   : > { %v185_v17 = vadd.f32 %v184_v12, %v183_v14 }
  0x23   : > { %v187_v19 = vadd.f32 %v186_v15, %v185_v17 }
  0x25   : > { %v189_v21 = vadd.f32 %v188_v18, %v187_v19 }
  0x27   : > { %v191_v22 = vadd.f32 %v190_v20, %v189_v21 }
  0x29   : > { %v192_v23 = vrot.slane %v191_v22, 4 }
  0x2b   : > { %v193_v24 = vadd.f32 %v192_v23, %v191_v22 }
  0x2d   : > { %v194_v25 = vrot.slane %v193_v24, 2 }
  0x2f   : > { %v195_v26 = vadd.f32 %v194_v25, %v193_v24 }
  0x31   : > { %v196_v27 = vrot.slane %v195_v26, 1 }
  0x33   : > { %v197_v28 = vadd.f32 %v196_v27, %v195_v26 }
  0x35   : > { %v198_v30 = vmul.f32 0.015625, %v197_v28 }
  0x37   : > { %v200_v31 = vmul.f32 %v199_v29, %v198_v30 }
  0x39   : > { %v202_v32 = vsel %vm201_vm1, %v200_v31, 0.0 }
  0x3a   : > { %203 = vadd.xlane.f32.xlu0 %v202_v32 }
  0xc7   : > { %v204_v33 = vpop.xlane.xlu0 %203 }
  0xc8   : > { %v205_v35 = vmax.f32 %v204_v33, 0.0 }
  0xca   : > { %v207_v36 = vmul.f32 %v206_v34, %v205_v35 }
  0xcc   : > { %v208_v37 = vsel %vm201_vm1, %v207_v36, 0.0 }
  0xcd   : > { %v209_v38 = vrot.slane %v208_v37, 4 }
  0xcf   : > { %v210_v39 = vadd.f32 %v209_v38, %v208_v37 }
  0xd1   : > { %v211_v40 = vrot.slane %v210_v39, 2 }
  0xd3   : > { %v212_v41 = vadd.f32 %v211_v40, %v210_v39 }
  0xd5   : > { %v213_v42 = vrot.slane %v212_v41, 1 }
  0xd7   : > { %v214_v43 = vadd.f32 %v213_v42, %v212_v41 }
  0xd9   : > { %v297_v44 = vmul.f32 -1.442695, %v214_v43 }
  0xdb   : > { %341 = vpow2.f32 %v297_v44 }
  0xe5   : > { %v342_v45 = vpop.eup %341 }
  0xe6   : > { %v218_v46 = vadd.f32 1.0, %v342_v45 }
  0xe8   : > { %343 = vrcp.f32 %v218_v46 }
  0xf2   : > { %v344_v47 = vpop.eup %343 }
  0xf3   : > { %222 = vst.msk [vmem:[%s162_s8] sm:$0x1] %vm221_vm2, %v344_v47 }
  0xf4   : > { %358 = shalt.err (!%p355_p3)
}
  0xf5   : > { %s359_s26 = scalar_lea.hbm %s502_s17, 16  ;;  %s363_s29 = scalar_lea.hbm %s547_s3, 32 }
  0xf6   : > { %p360_p4 = scmp.ne.s32.totalorder %s502_s17, %s359_s26  ;;  %p364_p9 = scmp.lt.u32.totalorder %s502_s17, %s547_s3 }
  0xf7   : > { %p365_p10 = scmp.lt.u32.totalorder %s363_s29, %s359_s26  ;;  %p367_p12 = scmp.lt.u32.totalorder %s359_s26, %s502_s17 }
  0xf8   : > { %p361_p7 = pnand %p360_p4, %p468_p5 }
  0xf9   : > { %p366_p11 = por %p365_p10, %p364_p9 }
  0xfa   : > { %p362_p8 = pneg %p361_p7 }
  0xfb   : > { %p368_p13 = por %p367_p12, %p366_p11 }
  0xfd   : > { %p369_p0 = pnand %p368_p13, %p362_p8 }
  0xff   : > { %372 = shalt.err (!%p369_p0)
}
 0x100   : > { %302 = dma.vmem_to_hbm [thread:$0]  (%p468_p5), %s504_s9, 16, %s502_s17, %s224_s19  }
 0x101 PF: > { %p308_p1 = scmp.ge.s32.totalorder %s407_s15, 2  ;;  %s248_s5 = sand.u32 1, %s395_s12  }
 0x102   : > { %s249_s6 = scalar_lea.sflag [#allocation3], %s248_s5 }
 0x103   : > { %p305_p2 = pnand %p308_p1, %p472_p6 }
 0x105   : > { %390 = dma.done.wait (!%p305_p2), %s249_s6, 16  }
 0x106   : > { %392 = vsyncadd (!%p305_p2), %s249_s6, 4294967280  ;;  %p13_p3 = scmp.ge.s32.totalorder %s455_s18, 4   ;;  %s550_s12 = smov %s399_s13 }
 0x107   : > { %s551_s13 = smov %s403_s14  ;;  %s552_s14 = smov %s466_s21 }
 0x108   : > { %s553_s15 = smov %s455_s18  ;;  %15 = sbr.rel (!%p13_p3) target bundleno = 3 (0x3), region = 67 }
 0x10f   :  { %253 = vsyncpa [#allocation3], 1 }
 0x110   :  { %255 = vsyncpa [#allocation3 + $0x1], 1 }

</bundles_post_ra>
